<compile_context>
chip_gen: v7x
topology: tpu7x:2x2x1
jax: 0.10.0
libtpu: 0.0.40
codegen_flags: <defaults>
</compile_context>

<pallas_src>
import functools

import jax
import jax.numpy as jnp
from jax.experimental import pallas as pl
from jax.experimental.pallas import tpu as pltpu


def _lstm_layer_kernel(x2d_ref, wih_ref, whh_ref, b_ref, h0_ref, c0_ref,
                       out_ref, hn_ref, cn_ref,
                       gi_sc, h_sc, c_sc, *, unroll):
    """One LSTM layer over the full sequence in a single invocation.

    x2d_ref : (T*B, D)   time-major, flattened over (T, B)
    wih_ref : (D, 4H)    W_ih^T
    whh_ref : (H, 4H)    W_hh^T
    b_ref   : (1, 4H)    b_ih + b_hh
    h0/c0   : (B, H)     initial carries (from the `hidden` argument)
    out_ref : (T, B, H)  per-step hidden states
    hn/cn   : (B, H)     final carries
    """
    T, B, H = out_ref.shape

    # ---- Hoisted input projection: one batched MXU matmul for all T steps.
    gi_sc[...] = (
        jnp.dot(x2d_ref[...], wih_ref[...], preferred_element_type=jnp.float32)
        + b_ref[...]
    )

    # ---- Load the recurrent weight and initialize the carries ONCE.
    whh = whh_ref[...]
    h_sc[...] = h0_ref[...]
    c_sc[...] = c0_ref[...]

    def step(t, carry):
        h = h_sc[...]
        c = c_sc[...]
        start = pl.multiple_of(t * B, B)
        gates = (gi_sc[pl.ds(start, B), :]                       # (B, 4H)
                 + jnp.dot(h, whh, preferred_element_type=jnp.float32))

        i_g = jax.nn.sigmoid(gates[:, 0 * H:1 * H])
        f_g = jax.nn.sigmoid(gates[:, 1 * H:2 * H])
        g_g = jnp.tanh(gates[:, 2 * H:3 * H])
        o_g = jax.nn.sigmoid(gates[:, 3 * H:4 * H])

        c_new = f_g * c + i_g * g_g
        h_new = o_g * jnp.tanh(c_new)

        h_sc[...] = h_new
        c_sc[...] = c_new
        out_ref[t] = h_new                                       # VMEM store
        return carry

    jax.lax.fori_loop(0, T, step, 0, unroll=unroll)

    hn_ref[...] = h_sc[...]
    cn_ref[...] = c_sc[...]


def _lstm_layer(x_btd, h0, c0, w_ih, w_hh, b_ih, b_hh):
    """Single LSTM layer. x_btd: (B, T, D); h0/c0: (B, H). Returns (out, h_n, c_n)."""
    B, T, D = x_btd.shape
    H = w_hh.shape[1]

    # Layout plumbing outside the kernel (tiny at these shapes).
    x_tbd = jnp.transpose(x_btd, (1, 0, 2)).astype(jnp.float32)   # (T, B, D)
    x2d = x_tbd.reshape(T * B, D)                                 # (T*B, D)
    wih_t = jnp.transpose(w_ih).astype(jnp.float32)               # (D, 4H)
    whh_t = jnp.transpose(w_hh).astype(jnp.float32)               # (H, 4H)
    bias = (b_ih + b_hh).astype(jnp.float32).reshape(1, 4 * H)    # (1, 4H)

    kernel = functools.partial(_lstm_layer_kernel,
                               unroll=True if T <= 32 else 8)

    def vmem_spec():
        return pl.BlockSpec(memory_space=pltpu.MemorySpace.VMEM)

    out_tbh, h_n, c_n = pl.pallas_call(
        kernel,
        out_shape=(
            jax.ShapeDtypeStruct((T, B, H), jnp.float32),
            jax.ShapeDtypeStruct((B, H), jnp.float32),
            jax.ShapeDtypeStruct((B, H), jnp.float32),
        ),
        in_specs=[vmem_spec() for _ in range(6)],
        out_specs=(vmem_spec(), vmem_spec(), vmem_spec()),
        scratch_shapes=[
            pltpu.VMEM((T * B, 4 * H), jnp.float32),   # hoisted input gates
            pltpu.VMEM((B, H), jnp.float32),           # h carry
            pltpu.VMEM((B, H), jnp.float32),           # c carry
        ],
    )(x2d, wih_t, whh_t, bias,
      h0.astype(jnp.float32), c0.astype(jnp.float32))

    output = jnp.transpose(out_tbh, (1, 0, 2))                    # (B, T, H)
    return output, h_n, c_n


def decoder_rnn_forward(x, hidden, layer_params):
    """DecoderRNN.forward(input, hidden).

    x            : (B, T, input_size)
    hidden       : (h_0, c_0), each (num_layers, B, hidden_size)
    layer_params : list of (w_ih, w_hh, b_ih, b_hh), one tuple per layer
    returns      : output (B, T, H), (h_n, c_n) each (num_layers, B, H)
    """
    h0_all, c0_all = hidden
    layer_in = x
    h_finals, c_finals = [], []
    for layer_idx, (w_ih, w_hh, b_ih, b_hh) in enumerate(layer_params):
        layer_out, h_l, c_l = _lstm_layer(
            layer_in, h0_all[layer_idx], c0_all[layer_idx],
            w_ih, w_hh, b_ih, b_hh)
        h_finals.append(h_l)
        c_finals.append(c_l)
        layer_in = layer_out
    return layer_in, (jnp.stack(h_finals, axis=0), jnp.stack(c_finals, axis=0))


def _lstm_reference(x, hidden, layer_params):
    """Pure-JAX reference (same math as torch.nn.LSTM, batch_first, given h_0/c_0)."""
    h0_all, c0_all = hidden
    layer_in = x
    hs, cs = [], []
    for layer_idx, (w_ih, w_hh, b_ih, b_hh) in enumerate(layer_params):
        b = b_ih + b_hh

        def step(carry, x_t, w_ih=w_ih, w_hh=w_hh, b=b):
            h, c = carry
            gates = x_t @ w_ih.T + h @ w_hh.T + b
            i, f, g, o = jnp.split(gates, 4, axis=-1)
            i, f, o = jax.nn.sigmoid(i), jax.nn.sigmoid(f), jax.nn.sigmoid(o)
            g = jnp.tanh(g)
            c_new = f * c + i * g
            h_new = o * jnp.tanh(c_new)
            return (h_new, c_new), h_new

        (h_n, c_n), out = jax.lax.scan(
            step, (h0_all[layer_idx], c0_all[layer_idx]),
            jnp.transpose(layer_in, (1, 0, 2)))
        hs.append(h_n)
        cs.append(c_n)
        layer_in = jnp.transpose(out, (1, 0, 2))
    return layer_in, (jnp.stack(hs, 0), jnp.stack(cs, 0))


if __name__ == "__main__":
    # Small shapes consistent with the module: batch=2, seq=8, input=16, hidden=32.
    B, T, D, H = 2, 8, 16, 32
    NUM_LAYERS = 1

    key = jax.random.PRNGKey(0)
    k_x, k_h, k_c, k1, k2, k3, k4 = jax.random.split(key, 7)

    # Deterministic PyTorch-style init: U(-1/sqrt(H), 1/sqrt(H)).
    s = 1.0 / jnp.sqrt(jnp.float32(H))
    w_ih = jax.random.uniform(k1, (4 * H, D), jnp.float32, -s, s)
    w_hh = jax.random.uniform(k2, (4 * H, H), jnp.float32, -s, s)
    b_ih = jax.random.uniform(k3, (4 * H,), jnp.float32, -s, s)
    b_hh = jax.random.uniform(k4, (4 * H,), jnp.float32, -s, s)
    layer_params = [(w_ih, w_hh, b_ih, b_hh)]

    x = jax.random.normal(k_x, (B, T, D), jnp.float32)
    h_0 = jax.random.normal(k_h, (NUM_LAYERS, B, H), jnp.float32) * 0.1
    c_0 = jax.random.normal(k_c, (NUM_LAYERS, B, H), jnp.float32) * 0.1

    fwd = jax.jit(decoder_rnn_forward)
    output, (h_n, c_n) = fwd(x, (h_0, c_0), layer_params)
    jax.block_until_ready((output, h_n, c_n))

    ref_out, (ref_h, ref_c) = _lstm_reference(x, (h_0, c_0), layer_params)
    assert output.shape == (B, T, H)
    assert h_n.shape == (NUM_LAYERS, B, H) and c_n.shape == (NUM_LAYERS, B, H)
    assert jnp.allclose(output, ref_out, atol=1e-3, rtol=1e-3)
    assert jnp.allclose(h_n, ref_h, atol=1e-3, rtol=1e-3)
    assert jnp.allclose(c_n, ref_c, atol=1e-3, rtol=1e-3)

    print("KERNEL_OK")
</pallas_src>

<mosaic_0001>
module attributes {stable_mosaic.version = 11 : i64} {
  func.func @_lstm_layer_kernel(%arg0: memref<16x16xf32, #tpu.memory_space<vmem>>, %arg1: memref<16x128xf32, #tpu.memory_space<vmem>>, %arg2: memref<32x128xf32, #tpu.memory_space<vmem>>, %arg3: memref<1x128xf32, #tpu.memory_space<vmem>>, %arg4: memref<2x32xf32, #tpu.memory_space<vmem>>, %arg5: memref<2x32xf32, #tpu.memory_space<vmem>>, %arg6: memref<8x2x32xf32, #tpu.memory_space<vmem>>, %arg7: memref<2x32xf32, #tpu.memory_space<vmem>>, %arg8: memref<2x32xf32, #tpu.memory_space<vmem>>, %arg9: memref<16x128xf32, #tpu.memory_space<vmem>>, %arg10: memref<2x32xf32, #tpu.memory_space<vmem>>, %arg11: memref<2x32xf32, #tpu.memory_space<vmem>>) attributes {dimension_semantics = [], scalar_prefetch = 0 : i64, scratch_operands = 3 : i64, tpu.core_type = #tpu.core_type<tc>} {
    %c0 = arith.constant 0 : index
    %c0_0 = arith.constant 0 : index
    %0 = vector.load %arg0[%c0, %c0_0] : memref<16x16xf32, #tpu.memory_space<vmem>>, vector<16x16xf32>
    %c0_1 = arith.constant 0 : index
    %c0_2 = arith.constant 0 : index
    %1 = vector.load %arg1[%c0_1, %c0_2] : memref<16x128xf32, #tpu.memory_space<vmem>>, vector<16x128xf32>
    %cst = arith.constant dense<0.000000e+00> : vector<16x128xf32>
    %2 = tpu.matmul %0, %1, %cst {dimension_numbers = #tpu.dot_dimension_numbers<[1], [0], [0], [1], [0, 0, 1, 1], [], []>} : vector<16x16xf32>, vector<16x128xf32>, vector<16x128xf32> -> vector<16x128xf32>
    %c0_3 = arith.constant 0 : index
    %c0_4 = arith.constant 0 : index
    %3 = vector.load %arg3[%c0_3, %c0_4] : memref<1x128xf32, #tpu.memory_space<vmem>>, vector<1x128xf32>
    %4 = vector.broadcast %3 : vector<1x128xf32> to vector<16x128xf32>
    %5 = arith.addf %2, %4 : vector<16x128xf32>
    %c0_5 = arith.constant 0 : index
    %c0_6 = arith.constant 0 : index
    %6 = vector.load %arg9[%c0_5, %c0_6] : memref<16x128xf32, #tpu.memory_space<vmem>>, vector<16x128xf32>
    tpu.vector_store %arg9[%c0_5, %c0_6], %5 {strides = array<i32>} : memref<16x128xf32, #tpu.memory_space<vmem>>, vector<16x128xf32>,
    %c0_7 = arith.constant 0 : index
    %c0_8 = arith.constant 0 : index
    %7 = vector.load %arg2[%c0_7, %c0_8] : memref<32x128xf32, #tpu.memory_space<vmem>>, vector<32x128xf32>
    %c0_9 = arith.constant 0 : index
    %c0_10 = arith.constant 0 : index
    %8 = vector.load %arg4[%c0_9, %c0_10] : memref<2x32xf32, #tpu.memory_space<vmem>>, vector<2x32xf32>
    %c0_11 = arith.constant 0 : index
    %c0_12 = arith.constant 0 : index
    %9 = vector.load %arg10[%c0_11, %c0_12] : memref<2x32xf32, #tpu.memory_space<vmem>>, vector<2x32xf32>
    tpu.vector_store %arg10[%c0_11, %c0_12], %8 {strides = array<i32>} : memref<2x32xf32, #tpu.memory_space<vmem>>, vector<2x32xf32>,
    %c0_13 = arith.constant 0 : index
    %c0_14 = arith.constant 0 : index
    %10 = vector.load %arg5[%c0_13, %c0_14] : memref<2x32xf32, #tpu.memory_space<vmem>>, vector<2x32xf32>
    %c0_15 = arith.constant 0 : index
    %c0_16 = arith.constant 0 : index
    %11 = vector.load %arg11[%c0_15, %c0_16] : memref<2x32xf32, #tpu.memory_space<vmem>>, vector<2x32xf32>
    tpu.vector_store %arg11[%c0_15, %c0_16], %10 {strides = array<i32>} : memref<2x32xf32, #tpu.memory_space<vmem>>, vector<2x32xf32>,
    %c0_i32 = arith.constant 0 : i32
    %c0_17 = arith.constant 0 : index
    %c0_18 = arith.constant 0 : index
    %12 = vector.load %arg10[%c0_17, %c0_18] : memref<2x32xf32, #tpu.memory_space<vmem>>, vector<2x32xf32>
    %c0_19 = arith.constant 0 : index
    %c0_20 = arith.constant 0 : index
    %13 = vector.load %arg11[%c0_19, %c0_20] : memref<2x32xf32, #tpu.memory_space<vmem>>, vector<2x32xf32>
    %c2_i32 = arith.constant 2 : i32
    %14 = arith.muli %c0_i32, %c2_i32 : i32
    %15 = tpu.assume_multiple %14, 2 : i32
    %16 = arith.index_cast %15 : i32 to index
    %c0_21 = arith.constant 0 : index
    %17 = vector.load %arg9[%16, %c0_21] : memref<16x128xf32, #tpu.memory_space<vmem>>, vector<2x128xf32>
    %cst_22 = arith.constant dense<0.000000e+00> : vector<2x128xf32>
    %18 = tpu.matmul %12, %7, %cst_22 {dimension_numbers = #tpu.dot_dimension_numbers<[1], [0], [0], [1], [0, 0, 1, 1], [], []>} : vector<2x32xf32>, vector<32x128xf32>, vector<2x128xf32> -> vector<2x128xf32>
    %19 = arith.addf %17, %18 : vector<2x128xf32>
    %20 = vector.extract_strided_slice %19 {offsets = [0, 0], sizes = [2, 32], strides = [1, 1]} : vector<2x128xf32> to vector<2x32xf32>
    %21 = arith.negf %20 : vector<2x32xf32>
    %22 = math.exp %21 : vector<2x32xf32>
    %cst_23 = arith.constant 1.000000e+00 : f32
    %23 = vector.broadcast %cst_23 : f32 to vector<2x32xf32>
    %24 = arith.addf %23, %22 : vector<2x32xf32>
    %25 = arith.divf %23, %24 : vector<2x32xf32>
    %26 = vector.extract_strided_slice %19 {offsets = [0, 32], sizes = [2, 32], strides = [1, 1]} : vector<2x128xf32> to vector<2x32xf32>
    %27 = arith.negf %26 : vector<2x32xf32>
    %28 = math.exp %27 : vector<2x32xf32>
    %cst_24 = arith.constant 1.000000e+00 : f32
    %29 = vector.broadcast %cst_24 : f32 to vector<2x32xf32>
    %30 = arith.addf %29, %28 : vector<2x32xf32>
    %31 = arith.divf %29, %30 : vector<2x32xf32>
    %32 = vector.extract_strided_slice %19 {offsets = [0, 64], sizes = [2, 32], strides = [1, 1]} : vector<2x128xf32> to vector<2x32xf32>
    %33 = math.tanh %32 : vector<2x32xf32>
    %34 = vector.extract_strided_slice %19 {offsets = [0, 96], sizes = [2, 32], strides = [1, 1]} : vector<2x128xf32> to vector<2x32xf32>
    %35 = arith.negf %34 : vector<2x32xf32>
    %36 = math.exp %35 : vector<2x32xf32>
    %cst_25 = arith.constant 1.000000e+00 : f32
    %37 = vector.broadcast %cst_25 : f32 to vector<2x32xf32>
    %38 = arith.addf %37, %36 : vector<2x32xf32>
    %39 = arith.divf %37, %38 : vector<2x32xf32>
    %40 = arith.mulf %31, %13 : vector<2x32xf32>
    %41 = arith.mulf %25, %33 : vector<2x32xf32>
    %42 = arith.addf %40, %41 : vector<2x32xf32>
    %43 = math.tanh %42 : vector<2x32xf32>
    %44 = arith.mulf %39, %43 : vector<2x32xf32>
    %c0_26 = arith.constant 0 : index
    %c0_27 = arith.constant 0 : index
    %45 = vector.load %arg10[%c0_26, %c0_27] : memref<2x32xf32, #tpu.memory_space<vmem>>, vector<2x32xf32>
    tpu.vector_store %arg10[%c0_26, %c0_27], %44 {strides = array<i32>} : memref<2x32xf32, #tpu.memory_space<vmem>>, vector<2x32xf32>,
    %c0_28 = arith.constant 0 : index
    %c0_29 = arith.constant 0 : index
    %46 = vector.load %arg11[%c0_28, %c0_29] : memref<2x32xf32, #tpu.memory_space<vmem>>, vector<2x32xf32>
    tpu.vector_store %arg11[%c0_28, %c0_29], %42 {strides = array<i32>} : memref<2x32xf32, #tpu.memory_space<vmem>>, vector<2x32xf32>,
    %47 = arith.index_cast %c0_i32 : i32 to index
    %c0_30 = arith.constant 0 : index
    %c0_31 = arith.constant 0 : index
    %48 = vector.load %arg6[%47, %c0_30, %c0_31] : memref<8x2x32xf32, #tpu.memory_space<vmem>>, vector<1x2x32xf32>
    %49 = vector.shape_cast %48 : vector<1x2x32xf32> to vector<2x32xf32>
    %50 = vector.shape_cast %44 : vector<2x32xf32> to vector<1x2x32xf32>
    tpu.vector_store %arg6[%47, %c0_30, %c0_31], %50 {strides = array<i32>} : memref<8x2x32xf32, #tpu.memory_space<vmem>>, vector<1x2x32xf32>,
    %c1_i32 = arith.constant 1 : i32
    %c0_32 = arith.constant 0 : index
    %c0_33 = arith.constant 0 : index
    %51 = vector.load %arg10[%c0_32, %c0_33] : memref<2x32xf32, #tpu.memory_space<vmem>>, vector<2x32xf32>
    %c0_34 = arith.constant 0 : index
    %c0_35 = arith.constant 0 : index
    %52 = vector.load %arg11[%c0_34, %c0_35] : memref<2x32xf32, #tpu.memory_space<vmem>>, vector<2x32xf32>
    %c2_i32_36 = arith.constant 2 : i32
    %53 = arith.muli %c1_i32, %c2_i32_36 : i32
    %54 = tpu.assume_multiple %53, 2 : i32
    %55 = arith.index_cast %54 : i32 to index
    %c0_37 = arith.constant 0 : index
    %56 = vector.load %arg9[%55, %c0_37] : memref<16x128xf32, #tpu.memory_space<vmem>>, vector<2x128xf32>
    %cst_38 = arith.constant dense<0.000000e+00> : vector<2x128xf32>
    %57 = tpu.matmul %51, %7, %cst_38 {dimension_numbers = #tpu.dot_dimension_numbers<[1], [0], [0], [1], [0, 0, 1, 1], [], []>} : vector<2x32xf32>, vector<32x128xf32>, vector<2x128xf32> -> vector<2x128xf32>
    %58 = arith.addf %56, %57 : vector<2x128xf32>
    %59 = vector.extract_strided_slice %58 {offsets = [0, 0], sizes = [2, 32], strides = [1, 1]} : vector<2x128xf32> to vector<2x32xf32>
    %60 = arith.negf %59 : vector<2x32xf32>
    %61 = math.exp %60 : vector<2x32xf32>
    %cst_39 = arith.constant 1.000000e+00 : f32
    %62 = vector.broadcast %cst_39 : f32 to vector<2x32xf32>
    %63 = arith.addf %62, %61 : vector<2x32xf32>
    %64 = arith.divf %62, %63 : vector<2x32xf32>
    %65 = vector.extract_strided_slice %58 {offsets = [0, 32], sizes = [2, 32], strides = [1, 1]} : vector<2x128xf32> to vector<2x32xf32>
    %66 = arith.negf %65 : vector<2x32xf32>
    %67 = math.exp %66 : vector<2x32xf32>
    %cst_40 = arith.constant 1.000000e+00 : f32
    %68 = vector.broadcast %cst_40 : f32 to vector<2x32xf32>
    %69 = arith.addf %68, %67 : vector<2x32xf32>
    %70 = arith.divf %68, %69 : vector<2x32xf32>
    %71 = vector.extract_strided_slice %58 {offsets = [0, 64], sizes = [2, 32], strides = [1, 1]} : vector<2x128xf32> to vector<2x32xf32>
    %72 = math.tanh %71 : vector<2x32xf32>
    %73 = vector.extract_strided_slice %58 {offsets = [0, 96], sizes = [2, 32], strides = [1, 1]} : vector<2x128xf32> to vector<2x32xf32>
    %74 = arith.negf %73 : vector<2x32xf32>
    %75 = math.exp %74 : vector<2x32xf32>
    %cst_41 = arith.constant 1.000000e+00 : f32
    %76 = vector.broadcast %cst_41 : f32 to vector<2x32xf32>
    %77 = arith.addf %76, %75 : vector<2x32xf32>
    %78 = arith.divf %76, %77 : vector<2x32xf32>
    %79 = arith.mulf %70, %52 : vector<2x32xf32>
    %80 = arith.mulf %64, %72 : vector<2x32xf32>
    %81 = arith.addf %79, %80 : vector<2x32xf32>
    %82 = math.tanh %81 : vector<2x32xf32>
    %83 = arith.mulf %78, %82 : vector<2x32xf32>
    %c0_42 = arith.constant 0 : index
    %c0_43 = arith.constant 0 : index
    %84 = vector.load %arg10[%c0_42, %c0_43] : memref<2x32xf32, #tpu.memory_space<vmem>>, vector<2x32xf32>
    tpu.vector_store %arg10[%c0_42, %c0_43], %83 {strides = array<i32>} : memref<2x32xf32, #tpu.memory_space<vmem>>, vector<2x32xf32>,
    %c0_44 = arith.constant 0 : index
    %c0_45 = arith.constant 0 : index
    %85 = vector.load %arg11[%c0_44, %c0_45] : memref<2x32xf32, #tpu.memory_space<vmem>>, vector<2x32xf32>
    tpu.vector_store %arg11[%c0_44, %c0_45], %81 {strides = array<i32>} : memref<2x32xf32, #tpu.memory_space<vmem>>, vector<2x32xf32>,
    %86 = arith.index_cast %c1_i32 : i32 to index
    %c0_46 = arith.constant 0 : index
    %c0_47 = arith.constant 0 : index
    %87 = vector.load %arg6[%86, %c0_46, %c0_47] : memref<8x2x32xf32, #tpu.memory_space<vmem>>, vector<1x2x32xf32>
    %88 = vector.shape_cast %87 : vector<1x2x32xf32> to vector<2x32xf32>
    %89 = vector.shape_cast %83 : vector<2x32xf32> to vector<1x2x32xf32>
    tpu.vector_store %arg6[%86, %c0_46, %c0_47], %89 {strides = array<i32>} : memref<8x2x32xf32, #tpu.memory_space<vmem>>, vector<1x2x32xf32>,
    %c2_i32_48 = arith.constant 2 : i32
    %c0_49 = arith.constant 0 : index
    %c0_50 = arith.constant 0 : index
    %90 = vector.load %arg10[%c0_49, %c0_50] : memref<2x32xf32, #tpu.memory_space<vmem>>, vector<2x32xf32>
    %c0_51 = arith.constant 0 : index
    %c0_52 = arith.constant 0 : index
    %91 = vector.load %arg11[%c0_51, %c0_52] : memref<2x32xf32, #tpu.memory_space<vmem>>, vector<2x32xf32>
    %c2_i32_53 = arith.constant 2 : i32
    %92 = arith.muli %c2_i32_48, %c2_i32_53 : i32
    %93 = tpu.assume_multiple %92, 2 : i32
    %94 = arith.index_cast %93 : i32 to index
    %c0_54 = arith.constant 0 : index
    %95 = vector.load %arg9[%94, %c0_54] : memref<16x128xf32, #tpu.memory_space<vmem>>, vector<2x128xf32>
    %cst_55 = arith.constant dense<0.000000e+00> : vector<2x128xf32>
    %96 = tpu.matmul %90, %7, %cst_55 {dimension_numbers = #tpu.dot_dimension_numbers<[1], [0], [0], [1], [0, 0, 1, 1], [], []>} : vector<2x32xf32>, vector<32x128xf32>, vector<2x128xf32> -> vector<2x128xf32>
    %97 = arith.addf %95, %96 : vector<2x128xf32>
    %98 = vector.extract_strided_slice %97 {offsets = [0, 0], sizes = [2, 32], strides = [1, 1]} : vector<2x128xf32> to vector<2x32xf32>
    %99 = arith.negf %98 : vector<2x32xf32>
    %100 = math.exp %99 : vector<2x32xf32>
    %cst_56 = arith.constant 1.000000e+00 : f32
    %101 = vector.broadcast %cst_56 : f32 to vector<2x32xf32>
    %102 = arith.addf %101, %100 : vector<2x32xf32>
    %103 = arith.divf %101, %102 : vector<2x32xf32>
    %104 = vector.extract_strided_slice %97 {offsets = [0, 32], sizes = [2, 32], strides = [1, 1]} : vector<2x128xf32> to vector<2x32xf32>
    %105 = arith.negf %104 : vector<2x32xf32>
    %106 = math.exp %105 : vector<2x32xf32>
    %cst_57 = arith.constant 1.000000e+00 : f32
    %107 = vector.broadcast %cst_57 : f32 to vector<2x32xf32>
    %108 = arith.addf %107, %106 : vector<2x32xf32>
    %109 = arith.divf %107, %108 : vector<2x32xf32>
    %110 = vector.extract_strided_slice %97 {offsets = [0, 64], sizes = [2, 32], strides = [1, 1]} : vector<2x128xf32> to vector<2x32xf32>
    %111 = math.tanh %110 : vector<2x32xf32>
    %112 = vector.extract_strided_slice %97 {offsets = [0, 96], sizes = [2, 32], strides = [1, 1]} : vector<2x128xf32> to vector<2x32xf32>
    %113 = arith.negf %112 : vector<2x32xf32>
    %114 = math.exp %113 : vector<2x32xf32>
    %cst_58 = arith.constant 1.000000e+00 : f32
    %115 = vector.broadcast %cst_58 : f32 to vector<2x32xf32>
    %116 = arith.addf %115, %114 : vector<2x32xf32>
    %117 = arith.divf %115, %116 : vector<2x32xf32>
    %118 = arith.mulf %109, %91 : vector<2x32xf32>
    %119 = arith.mulf %103, %111 : vector<2x32xf32>
    %120 = arith.addf %118, %119 : vector<2x32xf32>
    %121 = math.tanh %120 : vector<2x32xf32>
    %122 = arith.mulf %117, %121 : vector<2x32xf32>
    %c0_59 = arith.constant 0 : index
    %c0_60 = arith.constant 0 : index
    %123 = vector.load %arg10[%c0_59, %c0_60] : memref<2x32xf32, #tpu.memory_space<vmem>>, vector<2x32xf32>
    tpu.vector_store %arg10[%c0_59, %c0_60], %122 {strides = array<i32>} : memref<2x32xf32, #tpu.memory_space<vmem>>, vector<2x32xf32>,
    %c0_61 = arith.constant 0 : index
    %c0_62 = arith.constant 0 : index
    %124 = vector.load %arg11[%c0_61, %c0_62] : memref<2x32xf32, #tpu.memory_space<vmem>>, vector<2x32xf32>
    tpu.vector_store %arg11[%c0_61, %c0_62], %120 {strides = array<i32>} : memref<2x32xf32, #tpu.memory_space<vmem>>, vector<2x32xf32>,
    %125 = arith.index_cast %c2_i32_48 : i32 to index
    %c0_63 = arith.constant 0 : index
    %c0_64 = arith.constant 0 : index
    %126 = vector.load %arg6[%125, %c0_63, %c0_64] : memref<8x2x32xf32, #tpu.memory_space<vmem>>, vector<1x2x32xf32>
    %127 = vector.shape_cast %126 : vector<1x2x32xf32> to vector<2x32xf32>
    %128 = vector.shape_cast %122 : vector<2x32xf32> to vector<1x2x32xf32>
    tpu.vector_store %arg6[%125, %c0_63, %c0_64], %128 {strides = array<i32>} : memref<8x2x32xf32, #tpu.memory_space<vmem>>, vector<1x2x32xf32>,
    %c3_i32 = arith.constant 3 : i32
    %c0_65 = arith.constant 0 : index
    %c0_66 = arith.constant 0 : index
    %129 = vector.load %arg10[%c0_65, %c0_66] : memref<2x32xf32, #tpu.memory_space<vmem>>, vector<2x32xf32>
    %c0_67 = arith.constant 0 : index
    %c0_68 = arith.constant 0 : index
    %130 = vector.load %arg11[%c0_67, %c0_68] : memref<2x32xf32, #tpu.memory_space<vmem>>, vector<2x32xf32>
    %c2_i32_69 = arith.constant 2 : i32
    %131 = arith.muli %c3_i32, %c2_i32_69 : i32
    %132 = tpu.assume_multiple %131, 2 : i32
    %133 = arith.index_cast %132 : i32 to index
    %c0_70 = arith.constant 0 : index
    %134 = vector.load %arg9[%133, %c0_70] : memref<16x128xf32, #tpu.memory_space<vmem>>, vector<2x128xf32>
    %cst_71 = arith.constant dense<0.000000e+00> : vector<2x128xf32>
    %135 = tpu.matmul %129, %7, %cst_71 {dimension_numbers = #tpu.dot_dimension_numbers<[1], [0], [0], [1], [0, 0, 1, 1], [], []>} : vector<2x32xf32>, vector<32x128xf32>, vector<2x128xf32> -> vector<2x128xf32>
    %136 = arith.addf %134, %135 : vector<2x128xf32>
    %137 = vector.extract_strided_slice %136 {offsets = [0, 0], sizes = [2, 32], strides = [1, 1]} : vector<2x128xf32> to vector<2x32xf32>
    %138 = arith.negf %137 : vector<2x32xf32>
    %139 = math.exp %138 : vector<2x32xf32>
    %cst_72 = arith.constant 1.000000e+00 : f32
    %140 = vector.broadcast %cst_72 : f32 to vector<2x32xf32>
    %141 = arith.addf %140, %139 : vector<2x32xf32>
    %142 = arith.divf %140, %141 : vector<2x32xf32>
    %143 = vector.extract_strided_slice %136 {offsets = [0, 32], sizes = [2, 32], strides = [1, 1]} : vector<2x128xf32> to vector<2x32xf32>
    %144 = arith.negf %143 : vector<2x32xf32>
    %145 = math.exp %144 : vector<2x32xf32>
    %cst_73 = arith.constant 1.000000e+00 : f32
    %146 = vector.broadcast %cst_73 : f32 to vector<2x32xf32>
    %147 = arith.addf %146, %145 : vector<2x32xf32>
    %148 = arith.divf %146, %147 : vector<2x32xf32>
    %149 = vector.extract_strided_slice %136 {offsets = [0, 64], sizes = [2, 32], strides = [1, 1]} : vector<2x128xf32> to vector<2x32xf32>
    %150 = math.tanh %149 : vector<2x32xf32>
    %151 = vector.extract_strided_slice %136 {offsets = [0, 96], sizes = [2, 32], strides = [1, 1]} : vector<2x128xf32> to vector<2x32xf32>
    %152 = arith.negf %151 : vector<2x32xf32>
    %153 = math.exp %152 : vector<2x32xf32>
    %cst_74 = arith.constant 1.000000e+00 : f32
    %154 = vector.broadcast %cst_74 : f32 to vector<2x32xf32>
    %155 = arith.addf %154, %153 : vector<2x32xf32>
    %156 = arith.divf %154, %155 : vector<2x32xf32>
    %157 = arith.mulf %148, %130 : vector<2x32xf32>
    %158 = arith.mulf %142, %150 : vector<2x32xf32>
    %159 = arith.addf %157, %158 : vector<2x32xf32>
    %160 = math.tanh %159 : vector<2x32xf32>
    %161 = arith.mulf %156, %160 : vector<2x32xf32>
    %c0_75 = arith.constant 0 : index
    %c0_76 = arith.constant 0 : index
    %162 = vector.load %arg10[%c0_75, %c0_76] : memref<2x32xf32, #tpu.memory_space<vmem>>, vector<2x32xf32>
    tpu.vector_store %arg10[%c0_75, %c0_76], %161 {strides = array<i32>} : memref<2x32xf32, #tpu.memory_space<vmem>>, vector<2x32xf32>,
    %c0_77 = arith.constant 0 : index
    %c0_78 = arith.constant 0 : index
    %163 = vector.load %arg11[%c0_77, %c0_78] : memref<2x32xf32, #tpu.memory_space<vmem>>, vector<2x32xf32>
    tpu.vector_store %arg11[%c0_77, %c0_78], %159 {strides = array<i32>} : memref<2x32xf32, #tpu.memory_space<vmem>>, vector<2x32xf32>,
    %164 = arith.index_cast %c3_i32 : i32 to index
    %c0_79 = arith.constant 0 : index
    %c0_80 = arith.constant 0 : index
    %165 = vector.load %arg6[%164, %c0_79, %c0_80] : memref<8x2x32xf32, #tpu.memory_space<vmem>>, vector<1x2x32xf32>
    %166 = vector.shape_cast %165 : vector<1x2x32xf32> to vector<2x32xf32>
    %167 = vector.shape_cast %161 : vector<2x32xf32> to vector<1x2x32xf32>
    tpu.vector_store %arg6[%164, %c0_79, %c0_80], %167 {strides = array<i32>} : memref<8x2x32xf32, #tpu.memory_space<vmem>>, vector<1x2x32xf32>,
    %c4_i32 = arith.constant 4 : i32
    %c0_81 = arith.constant 0 : index
    %c0_82 = arith.constant 0 : index
    %168 = vector.load %arg10[%c0_81, %c0_82] : memref<2x32xf32, #tpu.memory_space<vmem>>, vector<2x32xf32>
    %c0_83 = arith.constant 0 : index
    %c0_84 = arith.constant 0 : index
    %169 = vector.load %arg11[%c0_83, %c0_84] : memref<2x32xf32, #tpu.memory_space<vmem>>, vector<2x32xf32>
    %c2_i32_85 = arith.constant 2 : i32
    %170 = arith.muli %c4_i32, %c2_i32_85 : i32
    %171 = tpu.assume_multiple %170, 2 : i32
    %172 = arith.index_cast %171 : i32 to index
    %c0_86 = arith.constant 0 : index
    %173 = vector.load %arg9[%172, %c0_86] : memref<16x128xf32, #tpu.memory_space<vmem>>, vector<2x128xf32>
    %cst_87 = arith.constant dense<0.000000e+00> : vector<2x128xf32>
    %174 = tpu.matmul %168, %7, %cst_87 {dimension_numbers = #tpu.dot_dimension_numbers<[1], [0], [0], [1], [0, 0, 1, 1], [], []>} : vector<2x32xf32>, vector<32x128xf32>, vector<2x128xf32> -> vector<2x128xf32>
    %175 = arith.addf %173, %174 : vector<2x128xf32>
    %176 = vector.extract_strided_slice %175 {offsets = [0, 0], sizes = [2, 32], strides = [1, 1]} : vector<2x128xf32> to vector<2x32xf32>
    %177 = arith.negf %176 : vector<2x32xf32>
    %178 = math.exp %177 : vector<2x32xf32>
    %cst_88 = arith.constant 1.000000e+00 : f32
    %179 = vector.broadcast %cst_88 : f32 to vector<2x32xf32>
    %180 = arith.addf %179, %178 : vector<2x32xf32>
    %181 = arith.divf %179, %180 : vector<2x32xf32>
    %182 = vector.extract_strided_slice %175 {offsets = [0, 32], sizes = [2, 32], strides = [1, 1]} : vector<2x128xf32> to vector<2x32xf32>
    %183 = arith.negf %182 : vector<2x32xf32>
    %184 = math.exp %183 : vector<2x32xf32>
    %cst_89 = arith.constant 1.000000e+00 : f32
    %185 = vector.broadcast %cst_89 : f32 to vector<2x32xf32>
    %186 = arith.addf %185, %184 : vector<2x32xf32>
    %187 = arith.divf %185, %186 : vector<2x32xf32>
    %188 = vector.extract_strided_slice %175 {offsets = [0, 64], sizes = [2, 32], strides = [1, 1]} : vector<2x128xf32> to vector<2x32xf32>
    %189 = math.tanh %188 : vector<2x32xf32>
    %190 = vector.extract_strided_slice %175 {offsets = [0, 96], sizes = [2, 32], strides = [1, 1]} : vector<2x128xf32> to vector<2x32xf32>
    %191 = arith.negf %190 : vector<2x32xf32>
    %192 = math.exp %191 : vector<2x32xf32>
    %cst_90 = arith.constant 1.000000e+00 : f32
    %193 = vector.broadcast %cst_90 : f32 to vector<2x32xf32>
    %194 = arith.addf %193, %192 : vector<2x32xf32>
    %195 = arith.divf %193, %194 : vector<2x32xf32>
    %196 = arith.mulf %187, %169 : vector<2x32xf32>
    %197 = arith.mulf %181, %189 : vector<2x32xf32>
    %198 = arith.addf %196, %197 : vector<2x32xf32>
    %199 = math.tanh %198 : vector<2x32xf32>
    %200 = arith.mulf %195, %199 : vector<2x32xf32>
    %c0_91 = arith.constant 0 : index
    %c0_92 = arith.constant 0 : index
    %201 = vector.load %arg10[%c0_91, %c0_92] : memref<2x32xf32, #tpu.memory_space<vmem>>, vector<2x32xf32>
    tpu.vector_store %arg10[%c0_91, %c0_92], %200 {strides = array<i32>} : memref<2x32xf32, #tpu.memory_space<vmem>>, vector<2x32xf32>,
    %c0_93 = arith.constant 0 : index
    %c0_94 = arith.constant 0 : index
    %202 = vector.load %arg11[%c0_93, %c0_94] : memref<2x32xf32, #tpu.memory_space<vmem>>, vector<2x32xf32>
    tpu.vector_store %arg11[%c0_93, %c0_94], %198 {strides = array<i32>} : memref<2x32xf32, #tpu.memory_space<vmem>>, vector<2x32xf32>,
    %203 = arith.index_cast %c4_i32 : i32 to index
    %c0_95 = arith.constant 0 : index
    %c0_96 = arith.constant 0 : index
    %204 = vector.load %arg6[%203, %c0_95, %c0_96] : memref<8x2x32xf32, #tpu.memory_space<vmem>>, vector<1x2x32xf32>
    %205 = vector.shape_cast %204 : vector<1x2x32xf32> to vector<2x32xf32>
    %206 = vector.shape_cast %200 : vector<2x32xf32> to vector<1x2x32xf32>
    tpu.vector_store %arg6[%203, %c0_95, %c0_96], %206 {strides = array<i32>} : memref<8x2x32xf32, #tpu.memory_space<vmem>>, vector<1x2x32xf32>,
    %c5_i32 = arith.constant 5 : i32
    %c0_97 = arith.constant 0 : index
    %c0_98 = arith.constant 0 : index
    %207 = vector.load %arg10[%c0_97, %c0_98] : memref<2x32xf32, #tpu.memory_space<vmem>>, vector<2x32xf32>
    %c0_99 = arith.constant 0 : index
    %c0_100 = arith.constant 0 : index
    %208 = vector.load %arg11[%c0_99, %c0_100] : memref<2x32xf32, #tpu.memory_space<vmem>>, vector<2x32xf32>
    %c2_i32_101 = arith.constant 2 : i32
    %209 = arith.muli %c5_i32, %c2_i32_101 : i32
    %210 = tpu.assume_multiple %209, 2 : i32
    %211 = arith.index_cast %210 : i32 to index
    %c0_102 = arith.constant 0 : index
    %212 = vector.load %arg9[%211, %c0_102] : memref<16x128xf32, #tpu.memory_space<vmem>>, vector<2x128xf32>
    %cst_103 = arith.constant dense<0.000000e+00> : vector<2x128xf32>
    %213 = tpu.matmul %207, %7, %cst_103 {dimension_numbers = #tpu.dot_dimension_numbers<[1], [0], [0], [1], [0, 0, 1, 1], [], []>} : vector<2x32xf32>, vector<32x128xf32>, vector<2x128xf32> -> vector<2x128xf32>
    %214 = arith.addf %212, %213 : vector<2x128xf32>
    %215 = vector.extract_strided_slice %214 {offsets = [0, 0], sizes = [2, 32], strides = [1, 1]} : vector<2x128xf32> to vector<2x32xf32>
    %216 = arith.negf %215 : vector<2x32xf32>
    %217 = math.exp %216 : vector<2x32xf32>
    %cst_104 = arith.constant 1.000000e+00 : f32
    %218 = vector.broadcast %cst_104 : f32 to vector<2x32xf32>
    %219 = arith.addf %218, %217 : vector<2x32xf32>
    %220 = arith.divf %218, %219 : vector<2x32xf32>
    %221 = vector.extract_strided_slice %214 {offsets = [0, 32], sizes = [2, 32], strides = [1, 1]} : vector<2x128xf32> to vector<2x32xf32>
    %222 = arith.negf %221 : vector<2x32xf32>
    %223 = math.exp %222 : vector<2x32xf32>
    %cst_105 = arith.constant 1.000000e+00 : f32
    %224 = vector.broadcast %cst_105 : f32 to vector<2x32xf32>
    %225 = arith.addf %224, %223 : vector<2x32xf32>
    %226 = arith.divf %224, %225 : vector<2x32xf32>
    %227 = vector.extract_strided_slice %214 {offsets = [0, 64], sizes = [2, 32], strides = [1, 1]} : vector<2x128xf32> to vector<2x32xf32>
    %228 = math.tanh %227 : vector<2x32xf32>
    %229 = vector.extract_strided_slice %214 {offsets = [0, 96], sizes = [2, 32], strides = [1, 1]} : vector<2x128xf32> to vector<2x32xf32>
    %230 = arith.negf %229 : vector<2x32xf32>
    %231 = math.exp %230 : vector<2x32xf32>
    %cst_106 = arith.constant 1.000000e+00 : f32
    %232 = vector.broadcast %cst_106 : f32 to vector<2x32xf32>
    %233 = arith.addf %232, %231 : vector<2x32xf32>
    %234 = arith.divf %232, %233 : vector<2x32xf32>
    %235 = arith.mulf %226, %208 : vector<2x32xf32>
    %236 = arith.mulf %220, %228 : vector<2x32xf32>
    %237 = arith.addf %235, %236 : vector<2x32xf32>
    %238 = math.tanh %237 : vector<2x32xf32>
    %239 = arith.mulf %234, %238 : vector<2x32xf32>
    %c0_107 = arith.constant 0 : index
    %c0_108 = arith.constant 0 : index
    %240 = vector.load %arg10[%c0_107, %c0_108] : memref<2x32xf32, #tpu.memory_space<vmem>>, vector<2x32xf32>
    tpu.vector_store %arg10[%c0_107, %c0_108], %239 {strides = array<i32>} : memref<2x32xf32, #tpu.memory_space<vmem>>, vector<2x32xf32>,
    %c0_109 = arith.constant 0 : index
    %c0_110 = arith.constant 0 : index
    %241 = vector.load %arg11[%c0_109, %c0_110] : memref<2x32xf32, #tpu.memory_space<vmem>>, vector<2x32xf32>
    tpu.vector_store %arg11[%c0_109, %c0_110], %237 {strides = array<i32>} : memref<2x32xf32, #tpu.memory_space<vmem>>, vector<2x32xf32>,
    %242 = arith.index_cast %c5_i32 : i32 to index
    %c0_111 = arith.constant 0 : index
    %c0_112 = arith.constant 0 : index
    %243 = vector.load %arg6[%242, %c0_111, %c0_112] : memref<8x2x32xf32, #tpu.memory_space<vmem>>, vector<1x2x32xf32>
    %244 = vector.shape_cast %243 : vector<1x2x32xf32> to vector<2x32xf32>
    %245 = vector.shape_cast %239 : vector<2x32xf32> to vector<1x2x32xf32>
    tpu.vector_store %arg6[%242, %c0_111, %c0_112], %245 {strides = array<i32>} : memref<8x2x32xf32, #tpu.memory_space<vmem>>, vector<1x2x32xf32>,
    %c6_i32 = arith.constant 6 : i32
    %c0_113 = arith.constant 0 : index
    %c0_114 = arith.constant 0 : index
    %246 = vector.load %arg10[%c0_113, %c0_114] : memref<2x32xf32, #tpu.memory_space<vmem>>, vector<2x32xf32>
    %c0_115 = arith.constant 0 : index
    %c0_116 = arith.constant 0 : index
    %247 = vector.load %arg11[%c0_115, %c0_116] : memref<2x32xf32, #tpu.memory_space<vmem>>, vector<2x32xf32>
    %c2_i32_117 = arith.constant 2 : i32
    %248 = arith.muli %c6_i32, %c2_i32_117 : i32
    %249 = tpu.assume_multiple %248, 2 : i32
    %250 = arith.index_cast %249 : i32 to index
    %c0_118 = arith.constant 0 : index
    %251 = vector.load %arg9[%250, %c0_118] : memref<16x128xf32, #tpu.memory_space<vmem>>, vector<2x128xf32>
    %cst_119 = arith.constant dense<0.000000e+00> : vector<2x128xf32>
    %252 = tpu.matmul %246, %7, %cst_119 {dimension_numbers = #tpu.dot_dimension_numbers<[1], [0], [0], [1], [0, 0, 1, 1], [], []>} : vector<2x32xf32>, vector<32x128xf32>, vector<2x128xf32> -> vector<2x128xf32>
    %253 = arith.addf %251, %252 : vector<2x128xf32>
    %254 = vector.extract_strided_slice %253 {offsets = [0, 0], sizes = [2, 32], strides = [1, 1]} : vector<2x128xf32> to vector<2x32xf32>
    %255 = arith.negf %254 : vector<2x32xf32>
    %256 = math.exp %255 : vector<2x32xf32>
    %cst_120 = arith.constant 1.000000e+00 : f32
    %257 = vector.broadcast %cst_120 : f32 to vector<2x32xf32>
    %258 = arith.addf %257, %256 : vector<2x32xf32>
    %259 = arith.divf %257, %258 : vector<2x32xf32>
    %260 = vector.extract_strided_slice %253 {offsets = [0, 32], sizes = [2, 32], strides = [1, 1]} : vector<2x128xf32> to vector<2x32xf32>
    %261 = arith.negf %260 : vector<2x32xf32>
    %262 = math.exp %261 : vector<2x32xf32>
    %cst_121 = arith.constant 1.000000e+00 : f32
    %263 = vector.broadcast %cst_121 : f32 to vector<2x32xf32>
    %264 = arith.addf %263, %262 : vector<2x32xf32>
    %265 = arith.divf %263, %264 : vector<2x32xf32>
    %266 = vector.extract_strided_slice %253 {offsets = [0, 64], sizes = [2, 32], strides = [1, 1]} : vector<2x128xf32> to vector<2x32xf32>
    %267 = math.tanh %266 : vector<2x32xf32>
    %268 = vector.extract_strided_slice %253 {offsets = [0, 96], sizes = [2, 32], strides = [1, 1]} : vector<2x128xf32> to vector<2x32xf32>
    %269 = arith.negf %268 : vector<2x32xf32>
    %270 = math.exp %269 : vector<2x32xf32>
    %cst_122 = arith.constant 1.000000e+00 : f32
    %271 = vector.broadcast %cst_122 : f32 to vector<2x32xf32>
    %272 = arith.addf %271, %270 : vector<2x32xf32>
    %273 = arith.divf %271, %272 : vector<2x32xf32>
    %274 = arith.mulf %265, %247 : vector<2x32xf32>
    %275 = arith.mulf %259, %267 : vector<2x32xf32>
    %276 = arith.addf %274, %275 : vector<2x32xf32>
    %277 = math.tanh %276 : vector<2x32xf32>
    %278 = arith.mulf %273, %277 : vector<2x32xf32>
    %c0_123 = arith.constant 0 : index
    %c0_124 = arith.constant 0 : index
    %279 = vector.load %arg10[%c0_123, %c0_124] : memref<2x32xf32, #tpu.memory_space<vmem>>, vector<2x32xf32>
    tpu.vector_store %arg10[%c0_123, %c0_124], %278 {strides = array<i32>} : memref<2x32xf32, #tpu.memory_space<vmem>>, vector<2x32xf32>,
    %c0_125 = arith.constant 0 : index
    %c0_126 = arith.constant 0 : index
    %280 = vector.load %arg11[%c0_125, %c0_126] : memref<2x32xf32, #tpu.memory_space<vmem>>, vector<2x32xf32>
    tpu.vector_store %arg11[%c0_125, %c0_126], %276 {strides = array<i32>} : memref<2x32xf32, #tpu.memory_space<vmem>>, vector<2x32xf32>,
    %281 = arith.index_cast %c6_i32 : i32 to index
    %c0_127 = arith.constant 0 : index
    %c0_128 = arith.constant 0 : index
    %282 = vector.load %arg6[%281, %c0_127, %c0_128] : memref<8x2x32xf32, #tpu.memory_space<vmem>>, vector<1x2x32xf32>
    %283 = vector.shape_cast %282 : vector<1x2x32xf32> to vector<2x32xf32>
    %284 = vector.shape_cast %278 : vector<2x32xf32> to vector<1x2x32xf32>
    tpu.vector_store %arg6[%281, %c0_127, %c0_128], %284 {strides = array<i32>} : memref<8x2x32xf32, #tpu.memory_space<vmem>>, vector<1x2x32xf32>,
    %c7_i32 = arith.constant 7 : i32
    %c0_129 = arith.constant 0 : index
    %c0_130 = arith.constant 0 : index
    %285 = vector.load %arg10[%c0_129, %c0_130] : memref<2x32xf32, #tpu.memory_space<vmem>>, vector<2x32xf32>
    %c0_131 = arith.constant 0 : index
    %c0_132 = arith.constant 0 : index
    %286 = vector.load %arg11[%c0_131, %c0_132] : memref<2x32xf32, #tpu.memory_space<vmem>>, vector<2x32xf32>
    %c2_i32_133 = arith.constant 2 : i32
    %287 = arith.muli %c7_i32, %c2_i32_133 : i32
    %288 = tpu.assume_multiple %287, 2 : i32
    %289 = arith.index_cast %288 : i32 to index
    %c0_134 = arith.constant 0 : index
    %290 = vector.load %arg9[%289, %c0_134] : memref<16x128xf32, #tpu.memory_space<vmem>>, vector<2x128xf32>
    %cst_135 = arith.constant dense<0.000000e+00> : vector<2x128xf32>
    %291 = tpu.matmul %285, %7, %cst_135 {dimension_numbers = #tpu.dot_dimension_numbers<[1], [0], [0], [1], [0, 0, 1, 1], [], []>} : vector<2x32xf32>, vector<32x128xf32>, vector<2x128xf32> -> vector<2x128xf32>
    %292 = arith.addf %290, %291 : vector<2x128xf32>
    %293 = vector.extract_strided_slice %292 {offsets = [0, 0], sizes = [2, 32], strides = [1, 1]} : vector<2x128xf32> to vector<2x32xf32>
    %294 = arith.negf %293 : vector<2x32xf32>
    %295 = math.exp %294 : vector<2x32xf32>
    %cst_136 = arith.constant 1.000000e+00 : f32
    %296 = vector.broadcast %cst_136 : f32 to vector<2x32xf32>
    %297 = arith.addf %296, %295 : vector<2x32xf32>
    %298 = arith.divf %296, %297 : vector<2x32xf32>
    %299 = vector.extract_strided_slice %292 {offsets = [0, 32], sizes = [2, 32], strides = [1, 1]} : vector<2x128xf32> to vector<2x32xf32>
    %300 = arith.negf %299 : vector<2x32xf32>
    %301 = math.exp %300 : vector<2x32xf32>
    %cst_137 = arith.constant 1.000000e+00 : f32
    %302 = vector.broadcast %cst_137 : f32 to vector<2x32xf32>
    %303 = arith.addf %302, %301 : vector<2x32xf32>
    %304 = arith.divf %302, %303 : vector<2x32xf32>
    %305 = vector.extract_strided_slice %292 {offsets = [0, 64], sizes = [2, 32], strides = [1, 1]} : vector<2x128xf32> to vector<2x32xf32>
    %306 = math.tanh %305 : vector<2x32xf32>
    %307 = vector.extract_strided_slice %292 {offsets = [0, 96], sizes = [2, 32], strides = [1, 1]} : vector<2x128xf32> to vector<2x32xf32>
    %308 = arith.negf %307 : vector<2x32xf32>
    %309 = math.exp %308 : vector<2x32xf32>
    %cst_138 = arith.constant 1.000000e+00 : f32
    %310 = vector.broadcast %cst_138 : f32 to vector<2x32xf32>
    %311 = arith.addf %310, %309 : vector<2x32xf32>
    %312 = arith.divf %310, %311 : vector<2x32xf32>
    %313 = arith.mulf %304, %286 : vector<2x32xf32>
    %314 = arith.mulf %298, %306 : vector<2x32xf32>
    %315 = arith.addf %313, %314 : vector<2x32xf32>
    %316 = math.tanh %315 : vector<2x32xf32>
    %317 = arith.mulf %312, %316 : vector<2x32xf32>
    %c0_139 = arith.constant 0 : index
    %c0_140 = arith.constant 0 : index
    %318 = vector.load %arg10[%c0_139, %c0_140] : memref<2x32xf32, #tpu.memory_space<vmem>>, vector<2x32xf32>
    tpu.vector_store %arg10[%c0_139, %c0_140], %317 {strides = array<i32>} : memref<2x32xf32, #tpu.memory_space<vmem>>, vector<2x32xf32>,
    %c0_141 = arith.constant 0 : index
    %c0_142 = arith.constant 0 : index
    %319 = vector.load %arg11[%c0_141, %c0_142] : memref<2x32xf32, #tpu.memory_space<vmem>>, vector<2x32xf32>
    tpu.vector_store %arg11[%c0_141, %c0_142], %315 {strides = array<i32>} : memref<2x32xf32, #tpu.memory_space<vmem>>, vector<2x32xf32>,
    %320 = arith.index_cast %c7_i32 : i32 to index
    %c0_143 = arith.constant 0 : index
    %c0_144 = arith.constant 0 : index
    %321 = vector.load %arg6[%320, %c0_143, %c0_144] : memref<8x2x32xf32, #tpu.memory_space<vmem>>, vector<1x2x32xf32>
    %322 = vector.shape_cast %321 : vector<1x2x32xf32> to vector<2x32xf32>
    %323 = vector.shape_cast %317 : vector<2x32xf32> to vector<1x2x32xf32>
    tpu.vector_store %arg6[%320, %c0_143, %c0_144], %323 {strides = array<i32>} : memref<8x2x32xf32, #tpu.memory_space<vmem>>, vector<1x2x32xf32>,
    %c8_i32 = arith.constant 8 : i32
    %c0_145 = arith.constant 0 : index
    %c0_146 = arith.constant 0 : index
    %324 = vector.load %arg10[%c0_145, %c0_146] : memref<2x32xf32, #tpu.memory_space<vmem>>, vector<2x32xf32>
    %c0_147 = arith.constant 0 : index
    %c0_148 = arith.constant 0 : index
    %325 = vector.load %arg7[%c0_147, %c0_148] : memref<2x32xf32, #tpu.memory_space<vmem>>, vector<2x32xf32>
    tpu.vector_store %arg7[%c0_147, %c0_148], %324 {strides = array<i32>} : memref<2x32xf32, #tpu.memory_space<vmem>>, vector<2x32xf32>,
    %c0_149 = arith.constant 0 : index
    %c0_150 = arith.constant 0 : index
    %326 = vector.load %arg11[%c0_149, %c0_150] : memref<2x32xf32, #tpu.memory_space<vmem>>, vector<2x32xf32>
    %c0_151 = arith.constant 0 : index
    %c0_152 = arith.constant 0 : index
    %327 = vector.load %arg8[%c0_151, %c0_152] : memref<2x32xf32, #tpu.memory_space<vmem>>, vector<2x32xf32>
    tpu.vector_store %arg8[%c0_151, %c0_152], %326 {strides = array<i32>} : memref<2x32xf32, #tpu.memory_space<vmem>>, vector<2x32xf32>,
    return
  }
}

</mosaic_0001>

<bundles_post_ra>
// kernel: decoder_rnn_forward.1
= control target key start
LH: loop header
LB: loop body
LE: loop exit
PB: predicated region body
PF: predicated region fallthrough
CT: control target
= control target key end

     0   :  { %14 = vsyncpa [#allocation6], 0  ;;  %vm39_vm0 = vcmask 130048   ;;  %v1448_v4 = vmov 0.0|0.0   ;;  %vm128_vm1 = vcmask 254976   ;;  %vm1449_vm2 = vmmov 0   ;;  %s1720_s0 = inlined_call_operand.vmem [shape: f32[16,16], index: 0, kind: input, shape index: {}]   ;;  %s1721_s1 = inlined_call_operand.vmem [shape: f32[16,128], index: 1, kind: input, shape index: {}]   ;;  %s1722_s2 = inlined_call_operand.vmem [shape: f32[32,128], index: 2, kind: input, shape index: {}]   ;;  %s1723_s3 = inlined_call_operand.vmem [shape: f32[1,128], index: 3, kind: input, shape index: {}]   ;;  %s1724_s4 = inlined_call_operand.vmem [shape: f32[2,32], index: 4, kind: input, shape index: {}]   ;;  %s1725_s5 = inlined_call_operand.vmem [shape: f32[2,32], index: 5, kind: input, shape index: {}]   ;;  %s1726_s6 = inlined_call_operand.vmem [shape: f32[8,2,32], index: 6, kind: output, shape index: {0}]   ;;  %s1727_s7 = inlined_call_operand.hbm [shape: f32[2,32], index: 7, kind: output, shape index: {1}]   ;;  %s1728_s8 = inlined_call_operand.hbm [shape: f32[2,32], index: 8, kind: output, shape index: {2}]  }
   0x1   :  { %v30_v0 = vld [vmem:[%s1721_s1] sm:$0xff]  ;;  %v31_v1 = vld [vmem:[%s1721_s1 + $0x8] sm:$0xff]  ;;  %1280 = vmatprep.subr.bf16.mxu1 %v1448_v4  ;;  %v125_v8 = vld [vmem:[%s1722_s2 + $0x10] sm:$0xff]  ;;  %v1450_v10 = vmov 0.0  }
   0x2   :  { %v28_v2 = vld [vmem:[%s1720_s0] sm:$0xff]  ;;  %v1276_v3 = vpack.c.bf16 %v31_v1, %v30_v0  ;;  %v124_v6 = vld [vmem:[%s1722_s2 + $0x8] sm:$0xff]  ;;  %v126_v9 = vld [vmem:[%s1722_s2 + $0x18] sm:$0xff]  ;;  %1196 = vmatprep.mubr.msk.f32.mxu1 %vm1449_vm2, %v1450_v10 }
   0x3   :  { %1185 = vmatprep.mubr.msk.f32.mxu0 %vm39_vm0, %v28_v2  ;;  %v123_v5 = vld [vmem:[%s1722_s2] sm:$0xff] }
   0x4   :  { %v1518_v7 = vpack.c.bf16 %v124_v6, %v123_v5  ;;  %v127_v11 = vld [vmem:[%s1724_s4] sm:$0x3]  ;;  %1277 = vmatprep.subr.bf16.mxu0 %v1276_v3 }
   0x5   :  { %129 = vst.msk [vmem:[#allocation3] sm:$0x3] %vm128_vm1, %v127_v11 }
   0x6   :  { %15 = vsyncpa [#allocation8], 0  ;;  %1279 = vmatpush3.bf16.msra.mxu0 %v1276_v3  ;;  %v29_v12 = vld [vmem:[%s1720_s0 + $0x8] sm:$0xff]  ;;  %1282 = vmatpush3.bf16.msra.mxu1 %v1518_v7  ;;  %v1536_v13 = vpack.c.bf16 %v126_v9, %v125_v8  ;;  %vm135_vm3 = vcmask 261120   ;;  %v130_v15 = vld [vmem:[%s1725_s5] sm:$0x3] }
   0x7   :  { %1283 = vmatprep.subr.bf16.mxu1 %v1448_v4  ;;  %1286 = vmatprep.subr.bf16.mxu0 %v1448_v4  ;;  %131 = vst.msk [vmem:[#allocation4] sm:$0x3] %vm128_vm1, %v130_v15  ;;  %v1111_v16 = vld [vmem:[%s1723_s3] ss:$0 sm:$0xff]  ;;  %s1451_s23 = smov 64   ;;  %s1452_s5 = smov 32  }
   0x8   :  { %s1453_s3 = smov 96   ;;  %s1454_s15 = smov [#allocation7]  }
   0x9   :  { %1186 = vmatmul.mubr.msk.f32.vlgmr.msra.gmra.mrb[0].mxu0 %vm39_vm0, %v29_v12  ;;  %s1097_s16 = sshll.u32 %s1454_s15, 4  ;;  %s1098_s16 = int_to_ptr.vmem [resolvable:$true] %s1097_s16 }
   0xa   :  { %1285 = vmatpush3.bf16.msra.mxu1 %v1536_v13  ;;  %1288 = vmatpush3.bf16.msra.mxu0 %v1518_v7  ;;  %s1400_s17 = scalar_lea.vmem %s1098_s16, 32  ;;  %p1405_p1 = scmp.lt.s32.totalorder %s1098_s16, %s1098_s16 }
   0xb   :  { %1289 = vmatprep.subr.bf16.mxu0 %v1448_v4  ;;  %1207 = vmatprep.mubr.msk.f32.mxu0 %vm1449_vm2, %v1450_v10  ;;  %p1401_p0 = scmp.ne.s32.totalorder %s1098_s16, %s1400_s17  ;;  %p1406_p2 = scmp.lt.s32.totalorder %s1400_s17, %s1400_s17 }
   0xc   :  { %v132_v14 = vld [vmem:[#allocation3] sm:$0x3]  ;;  %1292 = vmatprep.subr.bf16.mxu1 %v1448_v4 }
   0xd   :  { %1197 = vmatmul.mubr.msk.f32.vlgmr.msra.gmra.mrb[0].mxu1 %vm135_vm3, %v132_v14  ;;  %p1407_p3 = por %p1406_p2, %p1405_p1 }
   0xe   :  { %1291 = vmatpush3.bf16.msra.mxu0 %v1536_v13  ;;  %1294 = vmatpush3.bf16.msra.mxu1 %v1518_v7  ;;  %v133_v26 = vld [vmem:[#allocation4] sm:$0x3] }
   0xf   :  { %1295 = vmatprep.subr.bf16.mxu1 %v1448_v4  ;;  %1218 = vmatprep.mubr.msk.f32.mxu1 %vm1449_vm2, %v1450_v10  ;;  %p1408_p4 = pnand %p1407_p3, %p1401_p0 }
  0x10   :  { %1298 = vmatprep.subr.bf16.mxu0 %v1448_v4 }
  0x12   :  { %1297 = vmatpush3.bf16.msra.mxu1 %v1536_v13 }
  0x13   :  { %1304 = vmatprep.subr.bf16.mxu1 %v1448_v4 }
  0xdc   :  { %v1187_v17 = vpop.f32.mrb[0].mxu0 }
  0xdd   :  { %v118_v18 = vadd.f32 %v1187_v17, %v1111_v16  ;;  %v112_v19 = vpop.f32.mrb[1].mxu0 }
  0xde   :  { %v113_v20 = vadd.f32 %v1111_v16, %v112_v19 }
  0xdf   :  { %122 = vst [vmem:[#allocation2 + $0x8] sm:$0xff] %v118_v18 }
  0xe0   :  { %121 = vst [vmem:[#allocation2] sm:$0xff] %v113_v20  ;;  %v205_v21 = vpop.f32.mrb[0].mxu1 }
  0xe1   :  { %v1198_v22 = vpop.f32.mrb[1].mxu1 }
  0xe7   :  { %v134_v23 = vld [vmem:[#allocation2] sm:$0x3]  ;;  %v252_v44 = vld [vmem:[#allocation2 + $0x2] sm:$0x3]  ;;  %v370_v2 = vld [vmem:[#allocation2 + $0x4] sm:$0x3] }
  0xe8   :  { %v209_v24 = vadd.f32 %v205_v21, %v134_v23 }
  0xea   :  { %1336 = vtanh.f32 %v209_v24  ;;  %v1115_v27 = vmul.f32 -1.442695, %v209_v24 }
  0xec   :  { %1338 = vpow2.f32 %v1115_v27 }
  0xf4   :  { %v1337_v25 = vpop.eup %1336 }
  0xf5   :  { %223 = vrot.lane.b32.xlu0 %v1337_v25, %s1451_s23 }
  0xf6   :  { %v1339_v28 = vpop.eup %1338 }
  0xf7   :  { %v213_v29 = vadd.f32 1.0, %v1339_v28  ;;  %v488_v28 = vld [vmem:[#allocation2 + $0x6] sm:$0x3] }
  0xf9   :  { %218 = vrot.lane.b32.xlu0 %v133_v26, %s1452_s5  ;;  %1340 = vrcp.f32 %v213_v29 }
 0x103   :  { %v1341_v30 = vpop.eup %1340 }
 0x167   :  { %v224_v31 = vpop.permute.xlu0 %223 }
 0x168   :  { %v226_v32 = vmul.f32 %v1341_v30, %v224_v31 }
 0x16a   :  { %228 = vrot.lane.b32.xlu1 %v226_v32, %s1452_s5 }
 0x16b   :  { %v219_v33 = vpop.permute.xlu0 %218 }
 0x16c   :  { %v221_v34 = vmul.f32 %v1341_v30, %v219_v33 }
 0x1dc   :  { %v229_v35 = vpop.permute.xlu1 %228 }
 0x1dd   :  { %v231_v36 = vadd.f32 %v229_v35, %v221_v34 }
 0x1df   :  { %1342 = vtanh.f32 %v231_v36 }
 0x1e9   :  { %v1343_v37 = vpop.eup %1342 }
 0x1ea   :  { %234 = vrot.lane.b32.xlu1 %v1343_v37, %s1451_s23 }
 0x1ee   :  { %244 = vrot.lane.b32.xlu1 %v231_v36, %s1453_s3 }
 0x25c   :  { %v235_v38 = vpop.permute.xlu1 %234 }
 0x25d   :  { %v237_v39 = vmul.f32 %v1341_v30, %v235_v38 }
 0x25f   :  { %239 = vrot.lane.b32.xlu0 %v237_v39, %s1452_s5 }
 0x260   :  { %v245_v40 = vpop.permute.xlu1 %244 }
 0x261   :  { %247 = vst.msk [vmem:[#allocation4] sm:$0x3] %vm128_vm1, %v245_v40 }
 0x268   :  { %v250_v41 = vld [vmem:[#allocation4] sm:$0x3] }
 0x269   :  { %335 = vrot.lane.b32.xlu1 %v250_v41, %s1452_s5 }
 0x2d1   :  { %v240_v42 = vpop.permute.xlu0 %239 }
 0x2d2   :  { %242 = vst.msk [vmem:[#allocation3] sm:$0x3] %vm128_vm1, %v240_v42  ;;  %248 = vst.msk [vmem:[%s1726_s6] sm:$0x3] %vm128_vm1, %v240_v42 }
 0x2d9   :  { %v249_v43 = vld [vmem:[#allocation3] sm:$0x3] }
 0x2da   :  { %1208 = vmatmul.mubr.msk.f32.vlgmr.msra.gmra.mrb[2].mxu0 %vm135_vm3, %v249_v43 }
 0x2db   :  { %1300 = vmatpush3.bf16.msra.mxu0 %v1518_v7  ;;  %1229 = vmatprep.mubr.msk.f32.mxu0 %vm1449_vm2, %v1450_v10  ;;  %v336_v55 = vpop.permute.xlu1 %335 }
 0x2dc   :  { %1301 = vmatprep.subr.bf16.mxu0 %v1448_v4 }
 0x2df   :  { %1303 = vmatpush3.bf16.msra.mxu0 %v1536_v13 }
 0x2e0   :  { %1310 = vmatprep.subr.bf16.mxu0 %v1448_v4 }
 0x3ad   :  { %v322_v45 = vpop.f32.mrb[2].mxu0 }
 0x3ae   :  { %v326_v46 = vadd.f32 %v322_v45, %v252_v44  ;;  %v1209_v47 = vpop.f32.mrb[3].mxu0 }
 0x3b0   :  { %1344 = vtanh.f32 %v326_v46  ;;  %v1117_v49 = vmul.f32 -1.442695, %v326_v46 }
 0x3b2   :  { %1346 = vpow2.f32 %v1117_v49 }
 0x3ba   :  { %v1345_v48 = vpop.eup %1344 }
 0x3bb   :  { %340 = vrot.lane.b32.xlu0 %v1345_v48, %s1451_s23 }
 0x3bc   :  { %v1347_v50 = vpop.eup %1346 }
 0x3bd   :  { %v330_v51 = vadd.f32 1.0, %v1347_v50  ;;  %v606_v50 = vld [vmem:[#allocation2 + $0x8] sm:$0x3] }
 0x3bf   :  { %1348 = vrcp.f32 %v330_v51 }
 0x3c9   :  { %v1349_v52 = vpop.eup %1348 }
 0x3ca   :  { %v338_v56 = vmul.f32 %v1349_v52, %v336_v55 }
 0x42d   :  { %v341_v53 = vpop.permute.xlu0 %340 }
 0x42e   :  { %v343_v54 = vmul.f32 %v1349_v52, %v341_v53 }
 0x430   :  { %345 = vrot.lane.b32.xlu0 %v343_v54, %s1452_s5 }
 0x4a2   :  { %v346_v57 = vpop.permute.xlu0 %345 }
 0x4a3   :  { %v348_v58 = vadd.f32 %v346_v57, %v338_v56 }
 0x4a5   :  { %1350 = vtanh.f32 %v348_v58 }
 0x4af   :  { %v1351_v59 = vpop.eup %1350 }
 0x4b0   :  { %351 = vrot.lane.b32.xlu1 %v1351_v59, %s1451_s23 }
 0x4b4   :  { %361 = vrot.lane.b32.xlu1 %v348_v58, %s1453_s3 }
 0x522   :  { %v352_v60 = vpop.permute.xlu1 %351 }
 0x523   :  { %v354_v61 = vmul.f32 %v1349_v52, %v352_v60 }
 0x525   :  { %356 = vrot.lane.b32.xlu0 %v354_v61, %s1452_s5 }
 0x526   :  { %v362_v62 = vpop.permute.xlu1 %361 }
 0x527   :  { %364 = vst.msk [vmem:[#allocation4] sm:$0x3] %vm128_vm1, %v362_v62 }
 0x52e   :  { %v368_v63 = vld [vmem:[#allocation4] sm:$0x3] }
 0x52f   :  { %453 = vrot.lane.b32.xlu1 %v368_v63, %s1452_s5 }
 0x597   :  { %v357_v0 = vpop.permute.xlu0 %356 }
 0x598   :  { %359 = vst.msk [vmem:[#allocation3] sm:$0x3] %vm128_vm1, %v357_v0  ;;  %1118 = vst.msk [vmem:[%s1726_s6 + $0x2] sm:$0x3] %vm128_vm1, %v357_v0 }
 0x59f   :  { %v367_v1 = vld [vmem:[#allocation3] sm:$0x3] }
 0x5a0   :  { %1219 = vmatmul.mubr.msk.f32.vlgmr.msra.gmra.mrb[2].mxu1 %vm135_vm3, %v367_v1 }
 0x5a1   :  { %1306 = vmatpush3.bf16.msra.mxu1 %v1518_v7  ;;  %1240 = vmatprep.mubr.msk.f32.mxu1 %vm1449_vm2, %v1450_v10  ;;  %v454_v17 = vpop.permute.xlu1 %453 }
 0x5a2   :  { %1307 = vmatprep.subr.bf16.mxu1 %v1448_v4 }
 0x5a5   :  { %1309 = vmatpush3.bf16.msra.mxu1 %v1536_v13 }
 0x5a6   :  { %1316 = vmatprep.subr.bf16.mxu1 %v1448_v4 }
 0x673   :  { %v440_v3 = vpop.f32.mrb[2].mxu1 }
 0x674   :  { %v444_v5 = vadd.f32 %v440_v3, %v370_v2  ;;  %v1220_v6 = vpop.f32.mrb[3].mxu1 }
 0x676   :  { %1352 = vtanh.f32 %v444_v5  ;;  %v1120_v9 = vmul.f32 -1.442695, %v444_v5 }
 0x678   :  { %1354 = vpow2.f32 %v1120_v9 }
 0x680   :  { %v1353_v8 = vpop.eup %1352 }
 0x681   :  { %458 = vrot.lane.b32.xlu0 %v1353_v8, %s1451_s23 }
 0x682   :  { %v1355_v11 = vpop.eup %1354 }
 0x683   :  { %v448_v12 = vadd.f32 1.0, %v1355_v11  ;;  %v724_v11 = vld [vmem:[#allocation2 + $0xa] sm:$0x3] }
 0x685   :  { %1356 = vrcp.f32 %v448_v12 }
 0x68f   :  { %v1357_v14 = vpop.eup %1356 }
 0x690   :  { %v456_v18 = vmul.f32 %v1357_v14, %v454_v17 }
 0x6f3   :  { %v459_v15 = vpop.permute.xlu0 %458 }
 0x6f4   :  { %v461_v16 = vmul.f32 %v1357_v14, %v459_v15 }
 0x6f6   :  { %463 = vrot.lane.b32.xlu0 %v461_v16, %s1452_s5 }
 0x768   :  { %v464_v19 = vpop.permute.xlu0 %463 }
 0x769   :  { %v466_v20 = vadd.f32 %v464_v19, %v456_v18 }
 0x76b   :  { %1358 = vtanh.f32 %v466_v20 }
 0x775   :  { %v1359_v21 = vpop.eup %1358 }
 0x776   :  { %469 = vrot.lane.b32.xlu1 %v1359_v21, %s1451_s23 }
 0x77a   :  { %479 = vrot.lane.b32.xlu1 %v466_v20, %s1453_s3 }
 0x7e8   :  { %v470_v22 = vpop.permute.xlu1 %469 }
 0x7e9   :  { %v472_v23 = vmul.f32 %v1357_v14, %v470_v22 }
 0x7eb   :  { %474 = vrot.lane.b32.xlu0 %v472_v23, %s1452_s5 }
 0x7ec   :  { %v480_v24 = vpop.permute.xlu1 %479 }
 0x7ed   :  { %482 = vst.msk [vmem:[#allocation4] sm:$0x3] %vm128_vm1, %v480_v24 }
 0x7f4   :  { %v486_v25 = vld [vmem:[#allocation4] sm:$0x3] }
 0x7f5   :  { %571 = vrot.lane.b32.xlu1 %v486_v25, %s1452_s5 }
 0x85d   :  { %v475_v26 = vpop.permute.xlu0 %474 }
 0x85e   :  { %477 = vst.msk [vmem:[#allocation3] sm:$0x3] %vm128_vm1, %v475_v26  ;;  %1121 = vst.msk [vmem:[%s1726_s6 + $0x4] sm:$0x3] %vm128_vm1, %v475_v26 }
 0x865   :  { %v485_v27 = vld [vmem:[#allocation3] sm:$0x3] }
 0x866   :  { %1230 = vmatmul.mubr.msk.f32.vlgmr.msra.gmra.mrb[4].mxu0 %vm135_vm3, %v485_v27 }
 0x867   :  { %1312 = vmatpush3.bf16.msra.mxu0 %v1518_v7  ;;  %1251 = vmatprep.mubr.msk.f32.mxu0 %vm1449_vm2, %v1450_v10  ;;  %v572_v39 = vpop.permute.xlu1 %571 }
 0x868   :  { %1313 = vmatprep.subr.bf16.mxu0 %v1448_v4 }
 0x86b   :  { %1315 = vmatpush3.bf16.msra.mxu0 %v1536_v13 }
 0x86c   :  { %1322 = vmatprep.subr.bf16.mxu0 %v1448_v4 }
 0x939   :  { %v558_v29 = vpop.f32.mrb[4].mxu0 }
 0x93a   :  { %v562_v30 = vadd.f32 %v558_v29, %v488_v28  ;;  %v1231_v31 = vpop.f32.mrb[5].mxu0 }
 0x93c   :  { %1360 = vtanh.f32 %v562_v30  ;;  %v1123_v33 = vmul.f32 -1.442695, %v562_v30  ;;  %v842_v30 = vld [vmem:[#allocation2 + $0xc] sm:$0x3] }
 0x93e   :  { %1362 = vpow2.f32 %v1123_v33 }
 0x946   :  { %v1361_v32 = vpop.eup %1360 }
 0x947   :  { %576 = vrot.lane.b32.xlu0 %v1361_v32, %s1451_s23 }
 0x948   :  { %v1363_v34 = vpop.eup %1362 }
 0x949   :  { %v566_v35 = vadd.f32 1.0, %v1363_v34 }
 0x94b   :  { %1364 = vrcp.f32 %v566_v35 }
 0x955   :  { %v1365_v36 = vpop.eup %1364 }
 0x956   :  { %v574_v40 = vmul.f32 %v1365_v36, %v572_v39 }
 0x9b9   :  { %v577_v37 = vpop.permute.xlu0 %576 }
 0x9ba   :  { %v579_v38 = vmul.f32 %v1365_v36, %v577_v37 }
 0x9bc   :  { %581 = vrot.lane.b32.xlu0 %v579_v38, %s1452_s5 }
 0xa2e   :  { %v582_v41 = vpop.permute.xlu0 %581 }
 0xa2f   :  { %v584_v42 = vadd.f32 %v582_v41, %v574_v40 }
 0xa31   :  { %1366 = vtanh.f32 %v584_v42 }
 0xa3b   :  { %v1367_v43 = vpop.eup %1366 }
 0xa3c   :  { %587 = vrot.lane.b32.xlu1 %v1367_v43, %s1451_s23 }
 0xa40   :  { %597 = vrot.lane.b32.xlu1 %v584_v42, %s1453_s3 }
 0xaae   :  { %v588_v44 = vpop.permute.xlu1 %587 }
 0xaaf   :  { %v590_v45 = vmul.f32 %v1365_v36, %v588_v44 }
 0xab1   :  { %592 = vrot.lane.b32.xlu0 %v590_v45, %s1452_s5 }
 0xab2   :  { %v598_v46 = vpop.permute.xlu1 %597 }
 0xab3   :  { %600 = vst.msk [vmem:[#allocation4] sm:$0x3] %vm128_vm1, %v598_v46 }
 0xaba   :  { %v604_v47 = vld [vmem:[#allocation4] sm:$0x3] }
 0xabb   :  { %689 = vrot.lane.b32.xlu1 %v604_v47, %s1452_s5 }
 0xb23   :  { %v593_v48 = vpop.permute.xlu0 %592 }
 0xb24   :  { %595 = vst.msk [vmem:[#allocation3] sm:$0x3] %vm128_vm1, %v593_v48  ;;  %1124 = vst.msk [vmem:[%s1726_s6 + $0x6] sm:$0x3] %vm128_vm1, %v593_v48 }
 0xb2b   :  { %v603_v49 = vld [vmem:[#allocation3] sm:$0x3] }
 0xb2c   :  { %1241 = vmatmul.mubr.msk.f32.vlgmr.msra.gmra.mrb[4].mxu1 %vm135_vm3, %v603_v49 }
 0xb2d   :  { %1318 = vmatpush3.bf16.msra.mxu1 %v1518_v7  ;;  %1262 = vmatprep.mubr.msk.f32.mxu1 %vm1449_vm2, %v1450_v10  ;;  %v690_v61 = vpop.permute.xlu1 %689 }
 0xb2e   :  { %1319 = vmatprep.subr.bf16.mxu1 %v1448_v4 }
 0xb31   :  { %1321 = vmatpush3.bf16.msra.mxu1 %v1536_v13 }
 0xbff   :  { %v676_v51 = vpop.f32.mrb[4].mxu1 }
 0xc00   :  { %v680_v52 = vadd.f32 %v676_v51, %v606_v50  ;;  %v1242_v53 = vpop.f32.mrb[5].mxu1 }
 0xc02   :  { %1368 = vtanh.f32 %v680_v52  ;;  %v1126_v55 = vmul.f32 -1.442695, %v680_v52  ;;  %v960_v52 = vld [vmem:[#allocation2 + $0xe] sm:$0x3] }
 0xc04   :  { %1370 = vpow2.f32 %v1126_v55 }
 0xc0c   :  { %v1369_v54 = vpop.eup %1368 }
 0xc0d   :  { %694 = vrot.lane.b32.xlu0 %v1369_v54, %s1451_s23 }
 0xc0e   :  { %v1371_v56 = vpop.eup %1370 }
 0xc0f   :  { %v684_v57 = vadd.f32 1.0, %v1371_v56 }
 0xc11   :  { %1372 = vrcp.f32 %v684_v57 }
 0xc1b   :  { %v1373_v58 = vpop.eup %1372 }
 0xc1c   :  { %v692_v62 = vmul.f32 %v1373_v58, %v690_v61 }
 0xc7f   :  { %v695_v59 = vpop.permute.xlu0 %694 }
 0xc80   :  { %v697_v60 = vmul.f32 %v1373_v58, %v695_v59 }
 0xc82   :  { %699 = vrot.lane.b32.xlu0 %v697_v60, %s1452_s5 }
 0xcf4   :  { %v700_v63 = vpop.permute.xlu0 %699 }
 0xcf5   :  { %v702_v0 = vadd.f32 %v700_v63, %v692_v62 }
 0xcf7   :  { %1374 = vtanh.f32 %v702_v0 }
 0xd01   :  { %v1375_v1 = vpop.eup %1374 }
 0xd02   :  { %705 = vrot.lane.b32.xlu1 %v1375_v1, %s1451_s23 }
 0xd06   :  { %715 = vrot.lane.b32.xlu1 %v702_v0, %s1453_s3 }
 0xd74   :  { %v706_v2 = vpop.permute.xlu1 %705 }
 0xd75   :  { %v708_v3 = vmul.f32 %v1373_v58, %v706_v2 }
 0xd77   :  { %710 = vrot.lane.b32.xlu0 %v708_v3, %s1452_s5 }
 0xd78   :  { %v716_v5 = vpop.permute.xlu1 %715 }
 0xd79   :  { %718 = vst.msk [vmem:[#allocation4] sm:$0x3] %vm128_vm1, %v716_v5 }
 0xd80   :  { %v722_v6 = vld [vmem:[#allocation4] sm:$0x3] }
 0xd81   :  { %807 = vrot.lane.b32.xlu1 %v722_v6, %s1452_s5 }
 0xde9   :  { %v711_v8 = vpop.permute.xlu0 %710 }
 0xdea   :  { %713 = vst.msk [vmem:[#allocation3] sm:$0x3] %vm128_vm1, %v711_v8  ;;  %1127 = vst.msk [vmem:[%s1726_s6 + $0x8] sm:$0x3] %vm128_vm1, %v711_v8 }
 0xdf1   :  { %v721_v9 = vld [vmem:[#allocation3] sm:$0x3] }
 0xdf2   :  { %1252 = vmatmul.mubr.msk.f32.vlgmr.msra.gmra.mrb[6].mxu0 %vm135_vm3, %v721_v9 }
 0xdf3   :  { %1324 = vmatpush3.bf16.msra.mxu0 %v1518_v7  ;;  %1273 = vmatprep.mubr.msk.f32.mxu0 %vm1449_vm2, %v1450_v10 }
 0xdf4   :  { %1325 = vmatprep.subr.bf16.mxu0 %v1448_v4  ;;  %v808_v4 = vpop.permute.xlu1 %807 }
 0xdf7   :  { %1327 = vmatpush3.bf16.msra.mxu0 %v1536_v13 }
 0xec5   :  { %v794_v12 = vpop.f32.mrb[6].mxu0 }
 0xec6   :  { %v798_v14 = vadd.f32 %v794_v12, %v724_v11  ;;  %v1253_v15 = vpop.f32.mrb[7].mxu0 }
 0xec8   :  { %1376 = vtanh.f32 %v798_v14  ;;  %v1129_v17 = vmul.f32 -1.442695, %v798_v14 }
 0xeca   :  { %1378 = vpow2.f32 %v1129_v17 }
 0xed2   :  { %v1377_v16 = vpop.eup %1376 }
 0xed3   :  { %812 = vrot.lane.b32.xlu0 %v1377_v16, %s1451_s23 }
 0xed4   :  { %v1379_v18 = vpop.eup %1378 }
 0xed5   :  { %v802_v19 = vadd.f32 1.0, %v1379_v18 }
 0xed7   :  { %1380 = vrcp.f32 %v802_v19 }
 0xee1   :  { %v1381_v7 = vpop.eup %1380 }
 0xee2   :  { %v810_v13 = vmul.f32 %v1381_v7, %v808_v4 }
 0xf45   :  { %v813_v20 = vpop.permute.xlu0 %812 }
 0xf46   :  { %v815_v10 = vmul.f32 %v1381_v7, %v813_v20 }
 0xf48   :  { %817 = vrot.lane.b32.xlu0 %v815_v10, %s1452_s5 }
 0xfba   :  { %v818_v21 = vpop.permute.xlu0 %817 }
 0xfbb   :  { %v820_v22 = vadd.f32 %v818_v21, %v810_v13 }
 0xfbd   :  { %1382 = vtanh.f32 %v820_v22 }
 0xfc7   :  { %v1383_v23 = vpop.eup %1382 }
 0xfc8   :  { %823 = vrot.lane.b32.xlu1 %v1383_v23, %s1451_s23 }
 0xfcc   :  { %833 = vrot.lane.b32.xlu1 %v820_v22, %s1453_s3 }
0x103a   :  { %v824_v24 = vpop.permute.xlu1 %823 }
0x103b   :  { %v826_v25 = vmul.f32 %v1381_v7, %v824_v24 }
0x103d   :  { %828 = vrot.lane.b32.xlu0 %v826_v25, %s1452_s5 }
0x103e   :  { %v834_v26 = vpop.permute.xlu1 %833 }
0x103f   :  { %836 = vst.msk [vmem:[#allocation4] sm:$0x3] %vm128_vm1, %v834_v26 }
0x1046   :  { %v840_v27 = vld [vmem:[#allocation4] sm:$0x3] }
0x1047   :  { %925 = vrot.lane.b32.xlu1 %v840_v27, %s1452_s5 }
0x10af   :  { %v829_v28 = vpop.permute.xlu0 %828 }
0x10b0   :  { %831 = vst.msk [vmem:[#allocation3] sm:$0x3] %vm128_vm1, %v829_v28  ;;  %1130 = vst.msk [vmem:[%s1726_s6 + $0xa] sm:$0x3] %vm128_vm1, %v829_v28 }
0x10b7   :  { %v839_v29 = vld [vmem:[#allocation3] sm:$0x3] }
0x10b8   :  { %1263 = vmatmul.mubr.msk.f32.vlgmr.msra.gmra.mrb[6].mxu1 %vm135_vm3, %v839_v29 }
0x10b9   :  { %v926_v41 = vpop.permute.xlu1 %925 }
0x118b   :  { %v912_v31 = vpop.f32.mrb[6].mxu1 }
0x118c   :  { %v916_v32 = vadd.f32 %v912_v31, %v842_v30  ;;  %v1264_v33 = vpop.f32.mrb[7].mxu1 }
0x118e   :  { %1384 = vtanh.f32 %v916_v32  ;;  %v1132_v35 = vmul.f32 -1.442695, %v916_v32 }
0x1190   :  { %1386 = vpow2.f32 %v1132_v35 }
0x1198   :  { %v1385_v34 = vpop.eup %1384 }
0x1199   :  { %930 = vrot.lane.b32.xlu0 %v1385_v34, %s1451_s23 }
0x119a   :  { %v1387_v36 = vpop.eup %1386 }
0x119b   :  { %v920_v37 = vadd.f32 1.0, %v1387_v36 }
0x119d   :  { %1388 = vrcp.f32 %v920_v37 }
0x11a7   :  { %v1389_v38 = vpop.eup %1388 }
0x11a8   :  { %v928_v42 = vmul.f32 %v1389_v38, %v926_v41 }
0x120b   :  { %v931_v39 = vpop.permute.xlu0 %930 }
0x120c   :  { %v933_v40 = vmul.f32 %v1389_v38, %v931_v39 }
0x120e   :  { %935 = vrot.lane.b32.xlu0 %v933_v40, %s1452_s5 }
0x1280   :  { %v936_v43 = vpop.permute.xlu0 %935 }
0x1281   :  { %v938_v44 = vadd.f32 %v936_v43, %v928_v42 }
0x1283   :  { %1390 = vtanh.f32 %v938_v44 }
0x128d   :  { %v1391_v45 = vpop.eup %1390 }
0x128e   :  { %941 = vrot.lane.b32.xlu1 %v1391_v45, %s1451_s23 }
0x1292   :  { %951 = vrot.lane.b32.xlu1 %v938_v44, %s1453_s3 }
0x1300   :  { %v942_v46 = vpop.permute.xlu1 %941 }
0x1301   :  { %v944_v47 = vmul.f32 %v1389_v38, %v942_v46 }
0x1303   :  { %946 = vrot.lane.b32.xlu0 %v944_v47, %s1452_s5 }
0x1304   :  { %v952_v48 = vpop.permute.xlu1 %951 }
0x1305   :  { %954 = vst.msk [vmem:[#allocation4] sm:$0x3] %vm128_vm1, %v952_v48 }
0x130c   :  { %v958_v49 = vld [vmem:[#allocation4] sm:$0x3] }
0x130d   :  { %1043 = vrot.lane.b32.xlu1 %v958_v49, %s1452_s5 }
0x1375   :  { %v947_v50 = vpop.permute.xlu0 %946 }
0x1376   :  { %949 = vst.msk [vmem:[#allocation3] sm:$0x3] %vm128_vm1, %v947_v50  ;;  %1133 = vst.msk [vmem:[%s1726_s6 + $0xc] sm:$0x3] %vm128_vm1, %v947_v50 }
0x137d   :  { %v957_v51 = vld [vmem:[#allocation3] sm:$0x3] }
0x137e   :  { %1274 = vmatmul.mubr.msk.f32.vlgmr.msra.gmra.mrb[8].mxu0 %vm135_vm3, %v957_v51 }
0x137f   :  { %v1044_v63 = vpop.permute.xlu1 %1043 }
0x1451   :  { %v1030_v53 = vpop.f32.mrb[8].mxu0 }
0x1452   :  { %v1034_v54 = vadd.f32 %v1030_v53, %v960_v52  ;;  %v1275_v55 = vpop.f32.mrb[9].mxu0 }
0x1454   :  { %1392 = vtanh.f32 %v1034_v54  ;;  %v1135_v57 = vmul.f32 -1.442695, %v1034_v54 }
0x1456   :  { %1394 = vpow2.f32 %v1135_v57 }
0x145e   :  { %v1393_v56 = vpop.eup %1392 }
0x145f   :  { %1048 = vrot.lane.b32.xlu0 %v1393_v56, %s1451_s23 }
0x1460   :  { %v1395_v58 = vpop.eup %1394 }
0x1461   :  { %v1038_v59 = vadd.f32 1.0, %v1395_v58 }
0x1463   :  { %1396 = vrcp.f32 %v1038_v59 }
0x146d   :  { %v1397_v60 = vpop.eup %1396 }
0x146e   :  { %v1046_v0 = vmul.f32 %v1397_v60, %v1044_v63 }
0x14d1   :  { %v1049_v61 = vpop.permute.xlu0 %1048 }
0x14d2   :  { %v1051_v62 = vmul.f32 %v1397_v60, %v1049_v61 }
0x14d4   :  { %1053 = vrot.lane.b32.xlu0 %v1051_v62, %s1452_s5 }
0x1546   :  { %v1054_v1 = vpop.permute.xlu0 %1053 }
0x1547   :  { %v1056_v2 = vadd.f32 %v1054_v1, %v1046_v0 }
0x1549   :  { %1398 = vtanh.f32 %v1056_v2 }
0x1553   :  { %v1399_v3 = vpop.eup %1398 }
0x1554   :  { %1059 = vrot.lane.b32.xlu1 %v1399_v3, %s1451_s23 }
0x1558   :  { %1069 = vrot.lane.b32.xlu1 %v1056_v2, %s1453_s3 }
0x15c6   :  { %v1060_v5 = vpop.permute.xlu1 %1059 }
0x15c7   :  { %v1062_v6 = vmul.f32 %v1397_v60, %v1060_v5 }
0x15c9   :  { %1064 = vrot.lane.b32.xlu0 %v1062_v6, %s1452_s5 }
0x15ca   :  { %v1070_v8 = vpop.permute.xlu1 %1069 }
0x15cb   :  { %1072 = vst.msk [vmem:[#allocation4] sm:$0x3] %vm128_vm1, %v1070_v8 }
0x15d2   :  { %v1077_v9 = vld [vmem:[#allocation4] sm:$0x3] }
0x15d3   :  { %1078 = vst.msk [vmem:[#allocation7] sm:$0x3] %vm128_vm1, %v1077_v9 }
0x15d4   :  { %1411 = shalt.err (!%p1408_p4)
}
0x15d5   :  { %s1412_s20 = scalar_lea.hbm %s1728_s8, 32 }
0x15d6   :  { %p1413_p5 = scmp.ne.s32.totalorder %s1728_s8, %s1412_s20  ;;  %p1416_p6 = scmp.lt.u32.totalorder %s1412_s20, %s1728_s8 }
0x15d8   :  { %p1418_p7 = pnand %p1416_p6, %p1413_p5 }
0x15da   :  { %1421 = shalt.err (!%p1418_p7)
}
0x15db   :  { %1100 = dma.vmem_to_hbm [thread:$0]  %s1098_s16, 32, %s1728_s8, [#allocation8]  }
0x15dc   :  { %s1455_s24 = smov [#allocation5]  }
0x15dd   :  { %s1087_s25 = sshll.u32 %s1455_s24, 4  ;;  %s1088_s25 = int_to_ptr.vmem [resolvable:$true] %s1087_s25 }
0x15de   :  { %s1422_s26 = scalar_lea.vmem %s1088_s25, 32  ;;  %p1427_p9 = scmp.lt.s32.totalorder %s1088_s25, %s1088_s25 }
0x15df   :  { %p1423_p8 = scmp.ne.s32.totalorder %s1088_s25, %s1422_s26  ;;  %p1428_p10 = scmp.lt.s32.totalorder %s1422_s26, %s1422_s26 }
0x15e1   :  { %p1429_p11 = por %p1428_p10, %p1427_p9 }
0x15e3   :  { %p1430_p12 = pnand %p1429_p11, %p1423_p8 }
0x163b   :  { %v1065_v11 = vpop.permute.xlu0 %1064 }
0x163c   :  { %1067 = vst.msk [vmem:[#allocation3] sm:$0x3] %vm128_vm1, %v1065_v11  ;;  %1136 = vst.msk [vmem:[%s1726_s6 + $0xe] sm:$0x3] %vm128_vm1, %v1065_v11 }
0x1643   :  { %v1075_v12 = vld [vmem:[#allocation3] sm:$0x3] }
0x1644   :  { %1076 = vst.msk [vmem:[#allocation5] sm:$0x3] %vm128_vm1, %v1075_v12 }
0x1645   :  { %1433 = shalt.err (!%p1430_p12)
}
0x1646   :  { %s1434_s28 = scalar_lea.hbm %s1727_s7, 32 }
0x1647   :  { %p1435_p13 = scmp.ne.s32.totalorder %s1727_s7, %s1434_s28  ;;  %p1438_p0 = scmp.lt.u32.totalorder %s1434_s28, %s1727_s7 }
0x1649   :  { %p1440_p1 = pnand %p1438_p0, %p1435_p13 }
0x164b   :  { %1443 = shalt.err (!%p1440_p1)
}
0x164c   :  { %1090 = dma.vmem_to_hbm [thread:$0]  %s1088_s25, 32, %s1727_s7, [#allocation6]  }
0x164d   :  { %1444 = dma.done.wait [#allocation6], 32  }
0x164e   :  { %1445 = vsyncadd [#allocation6], 4294967264 }
0x164f   :  { %1446 = dma.done.wait [#allocation8], 32  }
0x1650   :  { %1447 = vsyncadd [#allocation8], 4294967264 }
0x1651   :  { %1109 = vsyncpa [#allocation6], 1 }
0x1652   :  { %1110 = vsyncpa [#allocation8], 1 }

</bundles_post_ra>
